<compile_context>
chip_gen: v5e
topology: v5e:2x2
jax: 0.10.0
libtpu: 0.0.40
codegen_flags: <defaults>
</compile_context>

<pallas_src>
import functools

import jax
import jax.numpy as jnp
from jax.experimental import pallas as pl
from jax.experimental.pallas import tpu as pltpu


def _round_up(x: int, m: int) -> int:
    return (x + m - 1) // m * m


def _pad2d(x, rows, cols):
    r, c = x.shape
    return jnp.pad(x, ((0, rows - r), (0, cols - c)))


# ---------------------------------------------------------------------------
# Fused kernel:
#   img_feat = image_flat @ W_img          (bf16 MXU, f32 acc)   [encoder stub]
#   txt_feat = prompts_flat @ W_txt        (bf16 MXU, f32 acc)   [encoder stub]
#   img_n    = img_feat * rsqrt(sum(img_feat^2))                 (f32, EUP)
#   txt_n    = txt_feat * rsqrt(sum(txt_feat^2))                 (f32, EUP)
#   txt_pad  = [txt_n ; zeros]  (128-row bf16 VMEM scratch, lane-dense logits)
#   logits   = exp(logit_scale) * (img_n @ txt_pad.T)            (bf16 MXU, f32 acc,
#                                                                 scale applied in f32)
# All operands are small and tile-aligned, so full-array VMEM blocks are used
# (no grid).
# ---------------------------------------------------------------------------
def _coop_fused_kernel(scale_ref, wimg_ref, wtxt_ref, imgx_ref, txtx_ref,
                       logits_ref, imgn_ref, txtn_ref, txt_pad_ref,
                       *, n_txt_rows):
    # Encoder stubs: bf16 MXU projections with f32 accumulation (inputs are
    # already bf16 -- no in-kernel cast / pack on the VPU).
    img_feat = jnp.dot(imgx_ref[...], wimg_ref[...],
                       preferred_element_type=jnp.float32)
    txt_feat = jnp.dot(txtx_ref[...], wtxt_ref[...],
                       preferred_element_type=jnp.float32)

    # L2 normalization in f32 via rsqrt (EUP slot).  Padded (all-zero) rows
    # map to 0 instead of NaN; real rows match PyTorch's x / x.norm().
    img_ss = jnp.sum(img_feat * img_feat, axis=-1, keepdims=True)
    txt_ss = jnp.sum(txt_feat * txt_feat, axis=-1, keepdims=True)
    img_n = img_feat * jnp.where(img_ss > 0.0, jax.lax.rsqrt(img_ss), 0.0)
    txt_n = txt_feat * jnp.where(txt_ss > 0.0, jax.lax.rsqrt(txt_ss), 0.0)

    img_n_bf = img_n.astype(jnp.bfloat16)
    txt_n_bf = txt_n.astype(jnp.bfloat16)

    # Copy the real text rows + explicit zero rows into the 128-row bf16
    # scratch (disjoint, unmasked stores), so the final logits MXU output and
    # its store are lane-dense (128-wide) without pushing 16x dead rows
    # through the text matmul / normalization above.
    pad_rows, pad_cols = txt_pad_ref.shape
    txt_pad_ref[pl.ds(0, n_txt_rows), :] = txt_n_bf
    if n_txt_rows < pad_rows:  # static
        txt_pad_ref[pl.ds(n_txt_rows, pad_rows - n_txt_rows), :] = jnp.zeros(
            (pad_rows - n_txt_rows, pad_cols), jnp.bfloat16)

    # logits = exp(logit_scale) * img_n @ txt_n.T
    # Contraction on the last dim of both operands; the scale is applied to
    # the f32 MXU result so the bf16 operands stay unit-scaled (no error
    # amplification by ~14.3x).
    # NOTE: verified intent is that Mosaic handles the (1,)x(1,) contraction
    # without an explicit VALU-path transpose of txt_pad; if a vxpose is
    # emitted it sits on the XLU slot, off the critical path at these sizes.
    scale = jnp.exp(scale_ref[0])
    unscaled = jax.lax.dot_general(
        img_n_bf, txt_pad_ref[...],
        dimension_numbers=(((1,), (1,)), ((), ())),
        preferred_element_type=jnp.float32)
    logits_ref[...] = scale * unscaled

    # Feature outputs in bf16 (module returns clip dtype / fp16 features);
    # halves writeback bytes.
    imgn_ref[...] = img_n_bf
    txtn_ref[...] = txt_n_bf


# ---------------------------------------------------------------------------
# Forward wrapper (padding / reshapes are layout plumbing in XLA; all compute
# happens in the single Pallas kernel above).
# ---------------------------------------------------------------------------
def custom_clip_coop_forward(image, params):
    """Returns (logits, image_features, text_features) like CustomCLIP_CoOp.forward."""
    B = image.shape[0]
    # TODO(synk): the real CLIP visual backbone (ResNet / ViT + [:, 0, :]) is not in
    #             the provided source; it is stubbed as flatten + linear projection.
    img_x = image.reshape(B, -1)

    # prompt_learner(): learned shared context prepended to per-class embeddings.
    ctx, cls_emb = params["ctx"], params["cls_emb"]
    n_cls = cls_emb.shape[0]
    prompts = jnp.concatenate(
        [jnp.broadcast_to(ctx[None], (n_cls,) + ctx.shape), cls_emb], axis=1)
    # TODO(synk): the real CLIP text transformer + EOT-token gather is not in the
    #             provided source; it is stubbed as flatten + linear projection.
    txt_x = prompts.reshape(n_cls, -1)

    w_img, w_txt = params["w_img"], params["w_txt"]
    D = w_img.shape[1]
    K_img, K_txt = w_img.shape[0], w_txt.shape[0]

    # bf16 MXU operands pack 16 rows per sublane tile -> pad M dims to 16 (not
    # 8) so every packed load is unmasked on all generations.  The text
    # projection / normalization run on N_txt rows only; only the logits
    # output lane axis is padded to 128 (via the in-kernel scratch).
    B_pad = _round_up(B, 16)
    N_txt = _round_up(n_cls, 16)
    N_logit = _round_up(n_cls, 128)
    D_pad = _round_up(D, 128)
    Ki_pad = _round_up(K_img, 128)
    Kt_pad = _round_up(K_txt, 128)

    # Activations and weights shipped to VMEM as bf16: halves HBM->VMEM DMA
    # bytes and removes in-kernel f32->bf16 packing (kernel is DMA-bound).
    img_x_p = _pad2d(img_x.astype(jnp.bfloat16), B_pad, Ki_pad)
    txt_x_p = _pad2d(txt_x.astype(jnp.bfloat16), N_txt, Kt_pad)
    w_img_p = _pad2d(w_img.astype(jnp.bfloat16), Ki_pad, D_pad)
    w_txt_p = _pad2d(w_txt.astype(jnp.bfloat16), Kt_pad, D_pad)

    kernel = functools.partial(_coop_fused_kernel, n_txt_rows=N_txt)

    # TODO(synk): if the stub projections are replaced by real ViT-scale encoders,
    #             switch to a gridded (M, N, K) matmul with a VMEM f32 accumulator;
    #             size double-buffered bf16 tiles against v7x's 64 MiB physical /
    #             32 MiB scoped VMEM (e.g. tm=256, tn=512, tk=1024 ~3.5 MiB live)
    #             and mark at least one grid axis "parallel" so v7x's second
    #             TensorCore is used.  w_img at real CLIP size (~147 MiB bf16)
    #             cannot be a full-array block on any generation.
    # TODO(synk): for a serving loop reusing the same weights every step, keep the
    #             bf16 weights resident via a cross-call VMEM prefetch (P10) instead
    #             of re-DMAing them per call; they dominate the HBM traffic here.
    logits_p, imgn_p, txtn_p = pl.pallas_call(
        kernel,
        in_specs=[
            pl.BlockSpec(memory_space=pltpu.MemorySpace.SMEM),   # logit_scale scalar
            pl.BlockSpec(memory_space=pltpu.MemorySpace.VMEM),   # image-encoder weight (largest DMA, issued first)
            pl.BlockSpec(memory_space=pltpu.MemorySpace.VMEM),   # text-encoder weight
            pl.BlockSpec(memory_space=pltpu.MemorySpace.VMEM),   # flattened image (bf16)
            pl.BlockSpec(memory_space=pltpu.MemorySpace.VMEM),   # flattened prompts (bf16)
        ],
        out_specs=(
            pl.BlockSpec(memory_space=pltpu.MemorySpace.VMEM),
            pl.BlockSpec(memory_space=pltpu.MemorySpace.VMEM),
            pl.BlockSpec(memory_space=pltpu.MemorySpace.VMEM),
        ),
        out_shape=(
            jax.ShapeDtypeStruct((B_pad, N_logit), jnp.float32),   # logits (padded)
            jax.ShapeDtypeStruct((B_pad, D_pad), jnp.bfloat16),    # img_n (padded)
            jax.ShapeDtypeStruct((N_txt, D_pad), jnp.bfloat16),    # txt_n (padded)
        ),
        scratch_shapes=[pltpu.VMEM((N_logit, D_pad), jnp.bfloat16)],
        compiler_params=pltpu.CompilerParams(vmem_limit_bytes=4 * 1024 * 1024),
    )(params["logit_scale"], w_img_p, w_txt_p, img_x_p, txt_x_p)

    # Strip padding back to the module's semantic shapes.
    return logits_p[:B, :n_cls], imgn_p[:B, :D], txtn_p[:n_cls, :D]


# ---------------------------------------------------------------------------
# Pure-JAX f32 reference of the same (stubbed) forward, for a sanity check.
# ---------------------------------------------------------------------------
def _ref_forward(image, params):
    B = image.shape[0]
    img_feat = image.reshape(B, -1) @ params["w_img"]
    n_cls = params["cls_emb"].shape[0]
    prompts = jnp.concatenate(
        [jnp.broadcast_to(params["ctx"][None], (n_cls,) + params["ctx"].shape),
         params["cls_emb"]], axis=1)
    txt_feat = prompts.reshape(n_cls, -1) @ params["w_txt"]
    img_n = img_feat / jnp.linalg.norm(img_feat, axis=-1, keepdims=True)
    txt_n = txt_feat / jnp.linalg.norm(txt_feat, axis=-1, keepdims=True)
    logits = jnp.exp(params["logit_scale"][0]) * img_n @ txt_n.T
    return logits, img_n, txt_n


if __name__ == "__main__":
    # Small shapes consistent with the module's forward.
    B, C, H, W = 2, 4, 16, 16        # image batch (NCHW)
    D = 32                           # joint embedding dim
    N_CLS = 8                        # number of class prompts
    N_CTX, CTX_DIM = 4, 32           # CoOp learned-context length / width
    SEQ = 8                          # total prompt sequence length

    key = jax.random.PRNGKey(0)
    ks = iter(jax.random.split(key, 8))

    image = jax.random.normal(next(ks), (B, C, H, W), jnp.float32)

    # Deterministic synthetic parameters (clip_model.dtype=float16 is modeled by
    # running the MXU in bf16; normalization math stays in f32).
    params = {
        "w_img": 0.02 * jax.random.normal(next(ks), (C * H * W, D), jnp.float32),
        "ctx":   0.02 * jax.random.normal(next(ks), (N_CTX, CTX_DIM), jnp.float32),
        "cls_emb": 0.02 * jax.random.normal(next(ks), (N_CLS, SEQ - N_CTX, CTX_DIM),
                                            jnp.float32),
        "w_txt": 0.02 * jax.random.normal(next(ks), (SEQ * CTX_DIM, D), jnp.float32),
        "logit_scale": jnp.array([jnp.log(1.0 / 0.07)], jnp.float32),
    }

    fwd = jax.jit(custom_clip_coop_forward)
    logits, img_feats, txt_feats = fwd(image, params)
    jax.block_until_ready((logits, img_feats, txt_feats))

    assert logits.shape == (B, N_CLS) and logits.dtype == jnp.float32
    assert img_feats.shape == (B, D)
    assert txt_feats.shape == (N_CLS, D)
    assert bool(jnp.all(jnp.isfinite(logits)))

    # Kernel runs the MXU in bf16 (reference is pure f32); with the logit scale
    # applied in f32 post-MXU the tolerance is much tighter than before.
    ref_logits, ref_img, ref_txt = _ref_forward(image, params)
    assert bool(jnp.all(jnp.abs(logits - ref_logits) < 0.1))
    assert bool(jnp.all(jnp.abs(img_feats.astype(jnp.float32) - ref_img) < 0.02))
    assert bool(jnp.all(jnp.abs(txt_feats.astype(jnp.float32) - ref_txt) < 0.02))

    print("KERNEL_OK")
</pallas_src>

<mosaic_0001>
module attributes {stable_mosaic.version = 11 : i64} {
  func.func @_coop_fused_kernel(%arg0: memref<1xf32, #tpu.memory_space<smem>>, %arg1: memref<1024x128xbf16, #tpu.memory_space<vmem>>, %arg2: memref<256x128xbf16, #tpu.memory_space<vmem>>, %arg3: memref<16x1024xbf16, #tpu.memory_space<vmem>>, %arg4: memref<16x256xbf16, #tpu.memory_space<vmem>>, %arg5: memref<16x128xf32, #tpu.memory_space<vmem>>, %arg6: memref<16x128xbf16, #tpu.memory_space<vmem>>, %arg7: memref<16x128xbf16, #tpu.memory_space<vmem>>, %arg8: memref<128x128xbf16, #tpu.memory_space<vmem>>) attributes {dimension_semantics = [], scalar_prefetch = 0 : i64, scratch_operands = 1 : i64, tpu.core_type = #tpu.core_type<tc>} {
    %c0 = arith.constant 0 : index
    %c0_0 = arith.constant 0 : index
    %0 = vector.load %arg3[%c0, %c0_0] : memref<16x1024xbf16, #tpu.memory_space<vmem>>, vector<16x1024xbf16>
    %c0_1 = arith.constant 0 : index
    %c0_2 = arith.constant 0 : index
    %1 = vector.load %arg1[%c0_1, %c0_2] : memref<1024x128xbf16, #tpu.memory_space<vmem>>, vector<1024x128xbf16>
    %cst = arith.constant dense<0.000000e+00> : vector<16x128xf32>
    %2 = tpu.matmul %0, %1, %cst {dimension_numbers = #tpu.dot_dimension_numbers<[1], [0], [0], [1], [0, 0, 1, 1], [], []>} : vector<16x1024xbf16>, vector<1024x128xbf16>, vector<16x128xf32> -> vector<16x128xf32>
    %c0_3 = arith.constant 0 : index
    %c0_4 = arith.constant 0 : index
    %3 = vector.load %arg4[%c0_3, %c0_4] : memref<16x256xbf16, #tpu.memory_space<vmem>>, vector<16x256xbf16>
    %c0_5 = arith.constant 0 : index
    %c0_6 = arith.constant 0 : index
    %4 = vector.load %arg2[%c0_5, %c0_6] : memref<256x128xbf16, #tpu.memory_space<vmem>>, vector<256x128xbf16>
    %cst_7 = arith.constant dense<0.000000e+00> : vector<16x128xf32>
    %5 = tpu.matmul %3, %4, %cst_7 {dimension_numbers = #tpu.dot_dimension_numbers<[1], [0], [0], [1], [0, 0, 1, 1], [], []>} : vector<16x256xbf16>, vector<256x128xbf16>, vector<16x128xf32> -> vector<16x128xf32>
    %6 = arith.mulf %2, %2 : vector<16x128xf32>
    %cst_8 = arith.constant dense<0.000000e+00> : vector<16xf32>
    %7 = vector.multi_reduction <add>, %6, %cst_8 [1] : vector<16x128xf32> to vector<16xf32>
    %8 = vector.shape_cast %7 : vector<16xf32> to vector<16x1xf32>
    %9 = arith.mulf %5, %5 : vector<16x128xf32>
    %cst_9 = arith.constant dense<0.000000e+00> : vector<16xf32>
    %10 = vector.multi_reduction <add>, %9, %cst_9 [1] : vector<16x128xf32> to vector<16xf32>
    %11 = vector.shape_cast %10 : vector<16xf32> to vector<16x1xf32>
    %cst_10 = arith.constant 0.000000e+00 : f32
    %12 = vector.broadcast %cst_10 : f32 to vector<16x1xf32>
    %13 = arith.cmpf ogt, %8, %12 : vector<16x1xf32>
    %14 = math.rsqrt %8 : vector<16x1xf32>
    %cst_11 = arith.constant 0.000000e+00 : f32
    %15 = vector.broadcast %cst_11 : f32 to vector<16x1xf32>
    %16 = arith.select %13, %14, %15 : vector<16x1xi1>, vector<16x1xf32>
    %17 = vector.broadcast %16 : vector<16x1xf32> to vector<16x128xf32>
    %18 = arith.mulf %2, %17 : vector<16x128xf32>
    %cst_12 = arith.constant 0.000000e+00 : f32
    %19 = vector.broadcast %cst_12 : f32 to vector<16x1xf32>
    %20 = arith.cmpf ogt, %11, %19 : vector<16x1xf32>
    %21 = math.rsqrt %11 : vector<16x1xf32>
    %cst_13 = arith.constant 0.000000e+00 : f32
    %22 = vector.broadcast %cst_13 : f32 to vector<16x1xf32>
    %23 = arith.select %20, %21, %22 : vector<16x1xi1>, vector<16x1xf32>
    %24 = vector.broadcast %23 : vector<16x1xf32> to vector<16x128xf32>
    %25 = arith.mulf %5, %24 : vector<16x128xf32>
    %26 = arith.truncf %18 : vector<16x128xf32> to vector<16x128xbf16>
    %27 = arith.truncf %25 : vector<16x128xf32> to vector<16x128xbf16>
    %c0_14 = arith.constant 0 : index
    %c0_15 = arith.constant 0 : index
    %28 = vector.load %arg8[%c0_14, %c0_15] : memref<128x128xbf16, #tpu.memory_space<vmem>>, vector<16x128xbf16>
    tpu.vector_store %arg8[%c0_14, %c0_15], %27 {strides = array<i32>} : memref<128x128xbf16, #tpu.memory_space<vmem>>, vector<16x128xbf16>,
    %cst_16 = arith.constant 0.000000e+00 : bf16
    %29 = vector.broadcast %cst_16 : bf16 to vector<112x128xbf16>
    %c16 = arith.constant 16 : index
    %c0_17 = arith.constant 0 : index
    %30 = vector.load %arg8[%c16, %c0_17] : memref<128x128xbf16, #tpu.memory_space<vmem>>, vector<112x128xbf16>
    tpu.vector_store %arg8[%c16, %c0_17], %29 {strides = array<i32>} : memref<128x128xbf16, #tpu.memory_space<vmem>>, vector<112x128xbf16>,
    %c0_18 = arith.constant 0 : index
    %31 = memref.load %arg0[%c0_18] : memref<1xf32, #tpu.memory_space<smem>>
    %32 = math.exp %31 : f32
    %c0_19 = arith.constant 0 : index
    %c0_20 = arith.constant 0 : index
    %33 = vector.load %arg8[%c0_19, %c0_20] : memref<128x128xbf16, #tpu.memory_space<vmem>>, vector<128x128xbf16>
    %cst_21 = arith.constant dense<0.000000e+00> : vector<16x128xf32>
    %34 = tpu.matmul %26, %33, %cst_21 {dimension_numbers = #tpu.dot_dimension_numbers<[1], [1], [0], [0], [0, 0, 1, 0], [], []>} : vector<16x128xbf16>, vector<128x128xbf16>, vector<16x128xf32> -> vector<16x128xf32>
    %35 = vector.broadcast %32 : f32 to vector<16x128xf32>
    %36 = arith.mulf %35, %34 : vector<16x128xf32>
    %c0_22 = arith.constant 0 : index
    %c0_23 = arith.constant 0 : index
    %37 = vector.load %arg5[%c0_22, %c0_23] : memref<16x128xf32, #tpu.memory_space<vmem>>, vector<16x128xf32>
    tpu.vector_store %arg5[%c0_22, %c0_23], %36 {strides = array<i32>} : memref<16x128xf32, #tpu.memory_space<vmem>>, vector<16x128xf32>,
    %c0_24 = arith.constant 0 : index
    %c0_25 = arith.constant 0 : index
    %38 = vector.load %arg6[%c0_24, %c0_25] : memref<16x128xbf16, #tpu.memory_space<vmem>>, vector<16x128xbf16>
    tpu.vector_store %arg6[%c0_24, %c0_25], %26 {strides = array<i32>} : memref<16x128xbf16, #tpu.memory_space<vmem>>, vector<16x128xbf16>,
    %c0_26 = arith.constant 0 : index
    %c0_27 = arith.constant 0 : index
    %39 = vector.load %arg7[%c0_26, %c0_27] : memref<16x128xbf16, #tpu.memory_space<vmem>>, vector<16x128xbf16>
    tpu.vector_store %arg7[%c0_26, %c0_27], %27 {strides = array<i32>} : memref<16x128xbf16, #tpu.memory_space<vmem>>, vector<16x128xbf16>,
    return
  }
}

</mosaic_0001>

<bundles_post_ra>
// kernel: custom_clip_coop_forward.1
= control target key start
LH: loop header
LB: loop body
LE: loop exit
PB: predicated region body
PF: predicated region fallthrough
CT: control target
= control target key end

     0   :  { %s1953_s1 = inlined_call_operand.vmem [shape: bf16[1024,128], index: 1, kind: input, shape index: {}]   ;;  %s1954_s3 = inlined_call_operand.vmem [shape: bf16[16,1024], index: 3, kind: input, shape index: {}]   ;;  %s1955_s2 = inlined_call_operand.vmem [shape: bf16[256,128], index: 2, kind: input, shape index: {}]   ;;  %s1956_s4 = inlined_call_operand.vmem [shape: bf16[16,256], index: 4, kind: input, shape index: {}]   ;;  %s1957_s0 = inlined_call_operand.<no memory space> [shape: f32[1], index: 0, kind: input, shape index: {}]   ;;  %s1958_s7 = inlined_call_operand.vmem [shape: bf16[16,128], index: 7, kind: output, shape index: {2}]   ;;  %s1959_s6 = inlined_call_operand.vmem [shape: bf16[16,128], index: 6, kind: output, shape index: {1}]   ;;  %s1960_s5 = inlined_call_operand.vmem [shape: f32[16,128], index: 5, kind: output, shape index: {0}]  }
   0x1   :  { %v1466_v0 = vld [vmem:[%s1953_s1 + $0x38] sm:$0xff]  ;;  %v1465_v3 = vld [vmem:[%s1953_s1 + $0x30] sm:$0xff]  ;;  %v1464_v6 = vld [vmem:[%s1953_s1 + $0x28] sm:$0xff] }
   0x2   :  { %v1474_v1 = vld [vmem:[%s1953_s1 + $0x78] sm:$0xff]  ;;  %585 = vmatpush.bf16.msra.mxu0 %v1466_v0  ;;  %v1473_v4 = vld [vmem:[%s1953_s1 + $0x70] sm:$0xff]  ;;  %v1472_v7 = vld [vmem:[%s1953_s1 + $0x68] sm:$0xff] }
   0x3   :  { %v1482_v2 = vld [vmem:[%s1953_s1 + $0xb8] sm:$0xff]  ;;  %599 = vmatpush.bf16.msra.mxu1 %v1474_v1  ;;  %v1481_v5 = vld [vmem:[%s1953_s1 + $0xb0] sm:$0xff]  ;;  %v1480_v8 = vld [vmem:[%s1953_s1 + $0xa8] sm:$0xff] }
   0x4   :  { %613 = vmatpush.bf16.msra.mxu3 %v1482_v2  ;;  %v1463_v9 = vld [vmem:[%s1953_s1 + $0x20] sm:$0xff]  ;;  %v1514_v11 = vld [vmem:[%s1953_s1 + $0x1b8] sm:$0xff]  ;;  %v1513_v13 = vld [vmem:[%s1953_s1 + $0x1b0] sm:$0xff] }
   0x5   :  { %v1471_v10 = vld [vmem:[%s1953_s1 + $0x60] sm:$0xff]  ;;  %669 = vmatpush.bf16.msra.mxu2 %v1514_v11  ;;  %v1462_v14 = vld [vmem:[%s1953_s1 + $0x18] sm:$0xff]  ;;  %v1512_v17 = vld [vmem:[%s1953_s1 + $0x1a8] sm:$0xff] }
   0x6   :  { %586 = vmatpush.bf16.msra.mxu0 %v1465_v3  ;;  %v1479_v12 = vld [vmem:[%s1953_s1 + $0xa0] sm:$0xff]  ;;  %v1470_v15 = vld [vmem:[%s1953_s1 + $0x58] sm:$0xff]  ;;  %v1461_v18 = vld [vmem:[%s1953_s1 + $0x10] sm:$0xff] }
   0x7   :  { %600 = vmatpush.bf16.msra.mxu1 %v1473_v4  ;;  %v1478_v16 = vld [vmem:[%s1953_s1 + $0x98] sm:$0xff]  ;;  %v1469_v19 = vld [vmem:[%s1953_s1 + $0x50] sm:$0xff]  ;;  %v1511_v21 = vld [vmem:[%s1953_s1 + $0x1a0] sm:$0xff] }
   0x8   :  { %614 = vmatpush.bf16.msra.mxu3 %v1481_v5  ;;  %v1477_v20 = vld [vmem:[%s1953_s1 + $0x90] sm:$0xff]  ;;  %v1460_v22 = vld [vmem:[%s1953_s1 + $0x8] sm:$0xff]  ;;  %v1459_v25 = vld [vmem:[%s1953_s1] sm:$0xff] }
   0x9   :  { %670 = vmatpush.bf16.msra.mxu2 %v1513_v13  ;;  %v1468_v23 = vld [vmem:[%s1953_s1 + $0x48] sm:$0xff]  ;;  %v1510_v26 = vld [vmem:[%s1953_s1 + $0x198] sm:$0xff]  ;;  %v1467_v27 = vld [vmem:[%s1953_s1 + $0x40] sm:$0xff] }
   0xa   :  { %587 = vmatpush.bf16.msra.mxu0 %v1464_v6  ;;  %v1476_v24 = vld [vmem:[%s1953_s1 + $0x88] sm:$0xff]  ;;  %v1475_v28 = vld [vmem:[%s1953_s1 + $0x80] sm:$0xff]  ;;  %v1498_v33 = vld [vmem:[%s1953_s1 + $0x138] sm:$0xff] }
   0xb   :  { %601 = vmatpush.bf16.msra.mxu1 %v1472_v7  ;;  %v1061_v29 = vld [vmem:[%s1954_s3] sm:$0xf]  ;;  %v1451_v31 = vld [vmem:[%s1954_s3 + $0x4] sm:$0xf]  ;;  %v1069_v34 = vld [vmem:[%s1954_s3 + $0x8] sm:$0xf] }
   0xc   :  { %615 = vmatpush.bf16.msra.mxu3 %v1480_v8  ;;  %v1455_v30 = vld [vmem:[%s1954_s3 + $0x1c] sm:$0xf0]  ;;  %v1063_v32 = vld [vmem:[%s1954_s3 + $0x20] sm:$0xf0]  ;;  %v1456_v35 = vld [vmem:[%s1954_s3 + $0x24] sm:$0xf0] }
   0xd   :  { %671 = vmatpush.bf16.msra.mxu2 %v1512_v17  ;;  %v1490_v36 = vld [vmem:[%s1953_s1 + $0xf8] sm:$0xff]  ;;  %v1062_v38 = vor.u32 %v1455_v30, %v1061_v29  ;;  %v1066_v39 = vor.u32 %v1451_v31, %v1063_v32  ;;  %v1070_v40 = vor.u32 %v1456_v35, %v1069_v34  ;;  %v1509_v41 = vld [vmem:[%s1953_s1 + $0x190] sm:$0xff]  ;;  %v1508_v45 = vld [vmem:[%s1953_s1 + $0x188] sm:$0xff] }
   0xe   :  { %588 = vmatpush.bf16.msra.mxu0 %v1463_v9  ;;  %v1506_v37 = vld [vmem:[%s1953_s1 + $0x178] sm:$0xff]  ;;  %v1497_v42 = vld [vmem:[%s1953_s1 + $0x130] sm:$0xff]  ;;  %v1496_v46 = vld [vmem:[%s1953_s1 + $0x128] sm:$0xff] }
   0xf   :  { %602 = vmatpush.bf16.msra.mxu1 %v1471_v10  ;;  %v1489_v43 = vld [vmem:[%s1953_s1 + $0xf0] sm:$0xff]  ;;  %v1488_v47 = vld [vmem:[%s1953_s1 + $0xe8] sm:$0xff]  ;;  %v1507_v49 = vld [vmem:[%s1953_s1 + $0x180] sm:$0xff] }
  0x10   :  { %616 = vmatpush.bf16.msra.mxu3 %v1479_v12  ;;  %v1505_v44 = vld [vmem:[%s1953_s1 + $0x170] sm:$0xff]  ;;  %v1504_v48 = vld [vmem:[%s1953_s1 + $0x168] sm:$0xff]  ;;  %v1085_v50 = vld [vmem:[%s1954_s3 + $0x18] sm:$0xf] }
  0x11   :  { %672 = vmatpush.bf16.msra.mxu2 %v1511_v21  ;;  %v1458_v51 = vld [vmem:[%s1954_s3 + $0x34] sm:$0xf0]  ;;  %v1495_v52 = vld [vmem:[%s1953_s1 + $0x120] sm:$0xff]  ;;  %v1493_v59 = vld [vmem:[%s1953_s1 + $0x110] sm:$0xff] }
  0x12   :  { %589 = vmatpush.bf16.msra.mxu0 %v1462_v14  ;;  %v1487_v53 = vld [vmem:[%s1953_s1 + $0xe0] sm:$0xff]  ;;  %v1086_v55 = vor.u32 %v1458_v51, %v1085_v50  ;;  %v1494_v56 = vld [vmem:[%s1953_s1 + $0x118] sm:$0xff]  ;;  %v1485_v60 = vld [vmem:[%s1953_s1 + $0xd0] sm:$0xff] }
  0x13   :  { %603 = vmatpush.bf16.msra.mxu1 %v1470_v15  ;;  %v1503_v54 = vld [vmem:[%s1953_s1 + $0x160] sm:$0xff]  ;;  %v1486_v57 = vld [vmem:[%s1953_s1 + $0xd8] sm:$0xff]  ;;  %v1501_v61 = vld [vmem:[%s1953_s1 + $0x150] sm:$0xff] }
  0x14   :  { %617 = vmatpush.bf16.msra.mxu3 %v1478_v16  ;;  %v1502_v58 = vld [vmem:[%s1953_s1 + $0x158] sm:$0xff]  ;;  %v1492_v62 = vld [vmem:[%s1953_s1 + $0x108] sm:$0xff]  ;;  %v1483_v1 = vld [vmem:[%s1953_s1 + $0xc0] sm:$0xff] }
  0x15   :  { %673 = vmatpush.bf16.msra.mxu2 %v1510_v26  ;;  %v1484_v63 = vld [vmem:[%s1953_s1 + $0xc8] sm:$0xff]  ;;  %v1491_v2 = vld [vmem:[%s1953_s1 + $0x100] sm:$0xff]  ;;  %v1077_v5 = vld [vmem:[%s1954_s3 + $0x10] sm:$0xf] }
  0x16   :  { %590 = vmatpush.bf16.msra.mxu0 %v1461_v18  ;;  %v1500_v0 = vld [vmem:[%s1953_s1 + $0x148] sm:$0xff]  ;;  %v1499_v3 = vld [vmem:[%s1953_s1 + $0x140] sm:$0xff]  ;;  %v1457_v6 = vld [vmem:[%s1954_s3 + $0x2c] sm:$0xf0] }
  0x17   :  { %604 = vmatpush.bf16.msra.mxu1 %v1469_v19  ;;  %v1452_v4 = vld [vmem:[%s1954_s3 + $0xc] sm:$0xf]  ;;  %v1453_v8 = vld [vmem:[%s1954_s3 + $0x14] sm:$0xf]  ;;  %v1522_v10 = vld [vmem:[%s1953_s1 + $0x1f8] sm:$0xff]  ;;  %v1078_v13 = vor.u32 %v1457_v6, %v1077_v5 }
  0x18   :  { %618 = vmatpush.bf16.msra.mxu3 %v1477_v20  ;;  %v1071_v7 = vld [vmem:[%s1954_s3 + $0x28] sm:$0xf0]  ;;  %v1079_v9 = vld [vmem:[%s1954_s3 + $0x30] sm:$0xf0]  ;;  %v1532_v11 = vld [vmem:[%s1955_s2 + $0x38] sm:$0xff] }
  0x19   :  { %674 = vmatpush.bf16.msra.mxu2 %v1509_v41  ;;  %v1540_v12 = vld [vmem:[%s1955_s2 + $0x78] sm:$0xff]  ;;  %v1074_v14 = vor.u32 %v1452_v4, %v1071_v7  ;;  %v1082_v15 = vor.u32 %v1453_v8, %v1079_v9  ;;  %v1521_v16 = vld [vmem:[%s1953_s1 + $0x1f0] sm:$0xff]  ;;  %v1520_v19 = vld [vmem:[%s1953_s1 + $0x1e8] sm:$0xff] }
  0x1a   :  { %591 = vmatpush.bf16.msra.mxu0 %v1460_v22  ;;  %v1531_v17 = vld [vmem:[%s1955_s2 + $0x30] sm:$0xff]  ;;  %v1530_v20 = vld [vmem:[%s1955_s2 + $0x28] sm:$0xff]  ;;  %v1519_v22 = vld [vmem:[%s1953_s1 + $0x1e0] sm:$0xff] }
  0x1b   :  { %605 = vmatpush.bf16.msra.mxu1 %v1468_v23  ;;  %v1539_v18 = vld [vmem:[%s1955_s2 + $0x70] sm:$0xff]  ;;  %v1538_v21 = vld [vmem:[%s1955_s2 + $0x68] sm:$0xff]  ;;  %v1529_v23 = vld [vmem:[%s1955_s2 + $0x20] sm:$0xff] }
  0x1c   :  { %619 = vmatpush.bf16.msra.mxu3 %v1476_v24  ;;  %v1537_v24 = vld [vmem:[%s1955_s2 + $0x60] sm:$0xff]  ;;  %v1528_v26 = vld [vmem:[%s1955_s2 + $0x18] sm:$0xff]  ;;  %v1527_v29 = vld [vmem:[%s1955_s2 + $0x10] sm:$0xff] }
  0x1d   :  { %675 = vmatpush.bf16.msra.mxu2 %v1508_v45  ;;  %v1535_v30 = vld [vmem:[%s1955_s2 + $0x50] sm:$0xff]  ;;  %v1516_v31 = vld [vmem:[%s1953_s1 + $0x1c8] sm:$0xff]  ;;  %v1515_v34 = vld [vmem:[%s1953_s1 + $0x1c0] sm:$0xff] }
  0x1e   :  { %592 = vmatpush.bf16.msra.mxu0 %v1459_v25  ;;  %v1518_v25 = vld [vmem:[%s1953_s1 + $0x1d8] sm:$0xff]  ;;  %v1526_v32 = vld [vmem:[%s1955_s2 + $0x8] sm:$0xff]  ;;  %v1525_v35 = vld [vmem:[%s1955_s2] sm:$0xff] }
  0x1f   :  { %606 = vmatpush.bf16.msra.mxu1 %v1467_v27  ;;  %v1536_v27 = vld [vmem:[%s1955_s2 + $0x58] sm:$0xff]  ;;  %v1523_v41 = vld [vmem:[%s1956_s4 + $0x4] sm:$0xf] }
  0x20   :  { %620 = vmatpush.bf16.msra.mxu3 %v1475_v28  ;;  %v1517_v28 = vld [vmem:[%s1953_s1 + $0x1d0] sm:$0xff] }
  0x21   :  { %593 = vmatmul.bf16.vlgmr.msra.gmra.mxu0 %v1062_v38  ;;  %676 = vmatpush.bf16.msra.mxu2 %v1507_v49  ;;  %v1349_v38 = vld [vmem:[%s1956_s4] sm:$0xf] }
  0x22   :  { %641 = vmatpush.bf16.msrb.mxu0 %v1498_v33  ;;  %607 = vmatmul.bf16.vlgmr.msra.gmra.mxu1 %v1066_v39  ;;  %v1534_v33 = vld [vmem:[%s1955_s2 + $0x48] sm:$0xff] }
  0x23   :  { %655 = vmatpush.bf16.msrb.mxu1 %v1506_v37  ;;  %621 = vmatmul.bf16.vlgmr.msra.gmra.mxu3 %v1070_v40  ;;  %v1087_v37 = vld [vmem:[%s1954_s3 + $0x38] sm:$0xf0]  ;;  %v1524_v39 = vld [vmem:[%s1956_s4 + $0x4] sm:$0xf0]  ;;  %v1533_v40 = vld [vmem:[%s1955_s2 + $0x40] sm:$0xff] }
  0x24   :  { %627 = vmatpush.bf16.msrb.mxu3 %v1490_v36  ;;  %677 = vmatmul.bf16.vlgmr.msra.gmra.mxu2 %v1086_v55  ;;  %v1454_v36 = vld [vmem:[%s1954_s3 + $0x1c] sm:$0xf] }
  0x26   :  { %642 = vmatpush.bf16.msrb.mxu0 %v1497_v42  ;;  %v1351_v42 = vld [vmem:[%s1956_s4 + $0x8] sm:$0xf0] }
  0x27   :  { %656 = vmatpush.bf16.msrb.mxu1 %v1505_v44  ;;  %v1350_v44 = vor.u32 %v1524_v39, %v1349_v38  ;;  %v1354_v45 = vor.u32 %v1523_v41, %v1351_v42 }
  0x28   :  { %628 = vmatpush.bf16.msrb.mxu3 %v1489_v43  ;;  %v1090_v43 = vor.u32 %v1454_v36, %v1087_v37 }
  0x2a   :  { %643 = vmatpush.bf16.msrb.mxu0 %v1496_v46 }
  0x2b   :  { %657 = vmatpush.bf16.msrb.mxu1 %v1504_v48 }
  0x2c   :  { %629 = vmatpush.bf16.msrb.mxu3 %v1488_v47 }
  0x2e   :  { %644 = vmatpush.bf16.msrb.mxu0 %v1495_v52 }
  0x2f   :  { %658 = vmatpush.bf16.msrb.mxu1 %v1503_v54 }
  0x30   :  { %630 = vmatpush.bf16.msrb.mxu3 %v1487_v53 }
  0x32   :  { %645 = vmatpush.bf16.msrb.mxu0 %v1494_v56  ;;  %v1577_v56 = vmov 0  }
  0x33   :  { %659 = vmatpush.bf16.msrb.mxu1 %v1502_v58  ;;  %947 = vst [vmem:[#allocation2 + $0x38] sm:$0xf] %v1577_v56 }
  0x34   :  { %631 = vmatpush.bf16.msrb.mxu3 %v1486_v57  ;;  %948 = vst [vmem:[#allocation2 + $0x3c] sm:$0xf] %v1577_v56 }
  0x35   :  { %935 = vst [vmem:[#allocation2 + $0x8] sm:$0xf] %v1577_v56 }
  0x36   :  { %646 = vmatpush.bf16.msrb.mxu0 %v1493_v59  ;;  %936 = vst [vmem:[#allocation2 + $0xc] sm:$0xf] %v1577_v56 }
  0x37   :  { %660 = vmatpush.bf16.msrb.mxu1 %v1501_v61  ;;  %937 = vst [vmem:[#allocation2 + $0x10] sm:$0xf] %v1577_v56 }
  0x38   :  { %632 = vmatpush.bf16.msrb.mxu3 %v1485_v60  ;;  %938 = vst [vmem:[#allocation2 + $0x14] sm:$0xf] %v1577_v56 }
  0x39   :  { %939 = vst [vmem:[#allocation2 + $0x18] sm:$0xf] %v1577_v56 }
  0x3a   :  { %647 = vmatpush.bf16.msrb.mxu0 %v1492_v62  ;;  %940 = vst [vmem:[#allocation2 + $0x1c] sm:$0xf] %v1577_v56 }
  0x3b   :  { %661 = vmatpush.bf16.msrb.mxu1 %v1500_v0  ;;  %v1548_v62 = vld [vmem:[#allocation2 + $0x38] sm:$0xff]  ;;  %941 = vst [vmem:[#allocation2 + $0x20] sm:$0xf] %v1577_v56 }
  0x3c   :  { %633 = vmatpush.bf16.msrb.mxu3 %v1484_v63  ;;  %942 = vst [vmem:[#allocation2 + $0x24] sm:$0xf] %v1577_v56  ;;  %1024 = vmatpush.bf16.xpose.msrb.mxu2 %v1548_v62 }
  0x3d   :  { %943 = vst [vmem:[#allocation2 + $0x28] sm:$0xf] %v1577_v56 }
  0x3e   :  { %648 = vmatpush.bf16.msrb.mxu0 %v1491_v2  ;;  %944 = vst [vmem:[#allocation2 + $0x2c] sm:$0xf] %v1577_v56 }
  0x3f   :  { %662 = vmatpush.bf16.msrb.mxu1 %v1499_v3  ;;  %945 = vst [vmem:[#allocation2 + $0x30] sm:$0xf] %v1577_v56 }
  0x40   :  { %634 = vmatpush.bf16.msrb.mxu3 %v1483_v1  ;;  %946 = vst [vmem:[#allocation2 + $0x34] sm:$0xf] %v1577_v56 }
  0x41   :  { %649 = vmatmul.bf16.vlgmr.msrb.gmra.mxu0 %v1078_v13 }
  0x42   :  { %837 = vmatpush.bf16.msra.mxu0 %v1532_v11  ;;  %663 = vmatmul.bf16.vlgmr.msrb.gmra.mxu1 %v1082_v15 }
  0x43   :  { %851 = vmatpush.bf16.msra.mxu1 %v1540_v12  ;;  %635 = vmatmul.bf16.vlgmr.msrb.gmra.mxu3 %v1074_v14 }
  0x44   :  { %683 = vmatpush.bf16.msra.mxu3 %v1522_v10 }
  0x46   :  { %838 = vmatpush.bf16.msra.mxu0 %v1531_v17 }
  0x47   :  { %852 = vmatpush.bf16.msra.mxu1 %v1539_v18  ;;  %v1547_v14 = vld [vmem:[#allocation2 + $0x30] sm:$0xff] }
  0x48   :  { %684 = vmatpush.bf16.msra.mxu3 %v1521_v16  ;;  %1025 = vmatpush.bf16.xpose.msrb.mxu2 %v1547_v14 }
  0x4a   :  { %839 = vmatpush.bf16.msra.mxu0 %v1530_v20 }
  0x4b   :  { %853 = vmatpush.bf16.msra.mxu1 %v1538_v21 }
  0x4c   :  { %685 = vmatpush.bf16.msra.mxu3 %v1520_v19 }
  0x4e   :  { %840 = vmatpush.bf16.msra.mxu0 %v1529_v23 }
  0x4f   :  { %854 = vmatpush.bf16.msra.mxu1 %v1537_v24 }
  0x50   :  { %686 = vmatpush.bf16.msra.mxu3 %v1519_v22 }
  0x52   :  { %841 = vmatpush.bf16.msra.mxu0 %v1528_v26  ;;  %v1545_v26 = vld [vmem:[#allocation2 + $0x20] sm:$0xff] }
  0x53   :  { %855 = vmatpush.bf16.msra.mxu1 %v1536_v27  ;;  %v1544_v27 = vld [vmem:[#allocation2 + $0x18] sm:$0xff] }
  0x54   :  { %687 = vmatpush.bf16.msra.mxu3 %v1518_v25  ;;  %v1546_v25 = vld [vmem:[#allocation2 + $0x28] sm:$0xff] }
  0x55   :  { %1026 = vmatpush.bf16.xpose.msrb.mxu2 %v1546_v25 }
  0x56   :  { %842 = vmatpush.bf16.msra.mxu0 %v1527_v29 }
  0x57   :  { %856 = vmatpush.bf16.msra.mxu1 %v1535_v30  ;;  %v1542_v30 = vld [vmem:[#allocation2 + $0x8] sm:$0xff] }
  0x58   :  { %688 = vmatpush.bf16.msra.mxu3 %v1517_v28  ;;  %v1543_v28 = vld [vmem:[#allocation2 + $0x10] sm:$0xff] }
  0x5a   :  { %843 = vmatpush.bf16.msra.mxu0 %v1526_v32 }
  0x5b   :  { %857 = vmatpush.bf16.msra.mxu1 %v1534_v33 }
  0x5c   :  { %689 = vmatpush.bf16.msra.mxu3 %v1516_v31 }
  0x5d   :  { %1027 = vmatpush.bf16.xpose.msrb.mxu2 %v1545_v26 }
  0x5e   :  { %844 = vmatpush.bf16.msra.mxu0 %v1525_v35 }
  0x5f   :  { %858 = vmatpush.bf16.msra.mxu1 %v1533_v40 }
  0x60   :  { %690 = vmatpush.bf16.msra.mxu3 %v1515_v34 }
  0x61   :  { %845 = vmatmul.bf16.vlgmr.msra.gmra.mxu0 %v1350_v44  ;;  %v950_v44 = vstv %s1957_s0 }
  0x62   :  { %859 = vmatmul.bf16.vlgmr.msra.gmra.mxu1 %v1354_v45 }
  0x63   :  { %691 = vmatmul.bf16.vlgmr.msra.gmra.mxu3 %v1090_v43 }
  0x65   :  { %1028 = vmatpush.bf16.xpose.msrb.mxu2 %v1544_v27 }
  0x6d   :  { %1029 = vmatpush.bf16.xpose.msrb.mxu2 %v1543_v28 }
  0x75   :  { %1030 = vmatpush.bf16.xpose.msrb.mxu2 %v1542_v30 }
  0x9e   :  { %v594_v46 = vpop.f32.mrf.mxu0 }
  0x9f   :  { %v608_v47 = vpop.f32.mrf.mxu1 }
  0xa0   :  { %v609_v54 = vadd.f32 %v608_v47, %v594_v46  ;;  %v951_v46 = vmul.f32 1.442695, %v950_v44 }
  0xa6   :  { %v622_v48 = vpop.f32.mrf.mxu3  ;;  %v596_v49 = vpop.f32.mrf.mxu0 }
  0xa7   :  { %v610_v50 = vpop.f32.mrf.mxu1  ;;  %v623_v57 = vadd.f32 %v622_v48, %v609_v54  ;;  %v678_v2 = vpop.f32.mrf.mxu2 }
  0xa8   :  { %v611_v61 = vadd.f32 %v610_v50, %v596_v49 }
  0xae   :  { %v624_v51 = vpop.f32.mrf.mxu3 }
  0xaf   :  { %v625_v1 = vadd.f32 %v624_v51, %v611_v61  ;;  %v680_v18 = vpop.f32.mrf.mxu2 }
  0xbe   :  { %v650_v52 = vpop.f32.mrf.mxu0 }
  0xbf   :  { %v664_v53 = vpop.f32.mrf.mxu1 }
  0xc6   :  { %v636_v55 = vpop.f32.mrf.mxu3  ;;  %v652_v58 = vpop.f32.mrf.mxu0 }
  0xc7   :  { %v637_v59 = vadd.f32 %v636_v55, %v623_v57  ;;  %v666_v60 = vpop.f32.mrf.mxu1 }
  0xc9   :  { %v651_v63 = vadd.f32 %v650_v52, %v637_v59 }
  0xcb   :  { %v665_v4 = vadd.f32 %v664_v53, %v651_v63 }
  0xcd   :  { %v679_v9 = vadd.f32 %v678_v2, %v665_v4 }
  0xce   :  { %v638_v0 = vpop.f32.mrf.mxu3 }
  0xcf   :  { %v639_v5 = vadd.f32 %v638_v0, %v625_v1 }
  0xd1   :  { %v653_v10 = vadd.f32 %v652_v58, %v639_v5 }
  0xd3   :  { %v667_v15 = vadd.f32 %v666_v60, %v653_v10 }
  0xd5   :  { %v681_v21 = vadd.f32 %v680_v18, %v667_v15 }
  0xde   :  { %v846_v3 = vpop.f32.mrf.mxu0 }
  0xdf   :  { %v860_v6 = vpop.f32.mrf.mxu1 }
  0xe0   :  { %v1918_v7 = vadd.f32 %v860_v6, %v846_v3 }
  0xe2   :  { %v871_v8 = vmul.f32 %v1918_v7, %v1918_v7 }
  0xe4   :  { %873 = vadd.xlane.f32.xlu0 %v871_v8 }
  0xe6   :  { %v692_v11 = vpop.f32.mrf.mxu3  ;;  %v848_v13 = vpop.f32.mrf.mxu0 }
  0xe7   :  { %v1922_v12 = vadd.f32 %v692_v11, %v679_v9  ;;  %v862_v16 = vpop.f32.mrf.mxu1 }
  0xe8   :  { %v1926_v19 = vadd.f32 %v862_v16, %v848_v13 }
  0xe9   :  { %v865_v17 = vmul.f32 %v1922_v12, %v1922_v12 }
  0xea   :  { %v872_v20 = vmul.f32 %v1926_v19, %v1926_v19 }
  0xeb   :  { %867 = vadd.xlane.f32.xlu1 %v865_v17 }
  0xec   :  { %875 = vadd.xlane.f32.xlu0 %v872_v20 }
  0xee   :  { %v694_v22 = vpop.f32.mrf.mxu3 }
  0xef   :  { %v1930_v23 = vadd.f32 %v694_v22, %v681_v21 }
  0xf1   :  { %v866_v24 = vmul.f32 %v1930_v23, %v1930_v23 }
  0xf3   :  { %869 = vadd.xlane.f32.xlu1 %v866_v24 }
 0x157   :  { %v874_v29 = vpop.xlane.xlu0 %873 }
 0x158   :  { %1567 = vrsqrt.f32 %v874_v29  ;;  %vm911_vm1 = vweird.f32 %v874_v29  ;;  %vm903_vm5 = vcmp.gt.f32.partialorder %v874_v29, 0.0 }
 0x15e   :  { %v868_v31 = vpop.xlane.xlu1 %867  ;;  %v1568_v32 = vpop.eup %1567 }
 0x15f   :  { %1569 = vrsqrt.f32 %v868_v31  ;;  %v906_v33 = vmul.f32 %v1568_v32, %v874_v29  ;;  %v876_v34 = vpop.xlane.xlu0 %875  ;;  %vm912_vm0 = vweird.f32 %v1568_v32  ;;  %vm885_vm7 = vweird.f32 %v868_v31 }
 0x160   :  { %1571 = vrsqrt.f32 %v876_v34  ;;  %vm913_vm2 = vmor %vm911_vm1, %vm912_vm0  ;;  %vm921_vm6 = vweird.f32 %v876_v34  ;;  %vm904_vm10 = vcmp.gt.f32.partialorder %v876_v34, 0.0  ;;  %vm877_vm12 = vcmp.gt.f32.partialorder %v868_v31, 0.0 }
 0x161   :  { %v907_v35 = vmul.f32 %v1568_v32, %v906_v33 }
 0x163   :  { %v908_v37 = vmul.f32 0.5, %v907_v35 }
 0x165   :  { %v1570_v36 = vpop.eup %1569  ;;  %v909_v40 = vsub.f32 1.5, %v908_v37 }
 0x166   :  { %v880_v38 = vmul.f32 %v1570_v36, %v868_v31  ;;  %v870_v39 = vpop.xlane.xlu1 %869  ;;  %v1572_v41 = vpop.eup %1571  ;;  %vm886_vm4 = vweird.f32 %v1570_v36 }
 0x167   :  { %1573 = vrsqrt.f32 %v870_v39  ;;  %v916_v43 = vmul.f32 %v1572_v41, %v876_v34  ;;  %v910_v47 = vmul.f32 %v1568_v32, %v909_v40  ;;  %vm922_vm3 = vweird.f32 %v1572_v41  ;;  %vm887_vm9 = vmor %vm885_vm7, %vm886_vm4 }
 0x168   :  { %v881_v42 = vmul.f32 %v1570_v36, %v880_v38  ;;  %1575 = vpow2.f32 %v951_v46  ;;  %vm923_vm8 = vmor %vm921_vm6, %vm922_vm3  ;;  %vm895_vm13 = vweird.f32 %v870_v39  ;;  %vm878_vm15 = vcmp.gt.f32.partialorder %v870_v39, 0.0 }
 0x169   :  { %v917_v48 = vmul.f32 %v1572_v41, %v916_v43  ;;  %v914_v53 = vsel %vm913_vm2, %v1568_v32, %v910_v47 }
 0x16a   :  { %v882_v45 = vmul.f32 0.5, %v881_v42  ;;  %v925_v59 = vsel %vm903_vm5, %v914_v53, 0.0 }
 0x16b   :  { %v918_v51 = vmul.f32 0.5, %v917_v48  ;;  %v927_v1 = vmul.f32 %v925_v59, %v1918_v7 }
 0x16c   :  { %v883_v49 = vsub.f32 1.5, %v882_v45 }
 0x16d   :  { %v1574_v50 = vpop.eup %1573  ;;  %v919_v54 = vsub.f32 1.5, %v918_v51 }
 0x16e   :  { %v890_v52 = vmul.f32 %v1574_v50, %v870_v39  ;;  %v884_v55 = vmul.f32 %v1570_v36, %v883_v49  ;;  %v1576_v58 = vpop.eup %1575  ;;  %vm896_vm11 = vweird.f32 %v1574_v50 }
 0x16f   :  { %v920_v57 = vmul.f32 %v1572_v41, %v919_v54  ;;  %1564 = vpush %v1576_v58  ;;  %vm897_vm14 = vmor %vm895_vm13, %vm896_vm11 }
 0x170   :  { %v891_v56 = vmul.f32 %v1574_v50, %v890_v52  ;;  %v888_v62 = vsel %vm887_vm9, %v1570_v36, %v884_v55 }
 0x171   :  { %v924_v61 = vsel %vm923_vm8, %v1572_v41, %v920_v57  ;;  %v899_v4 = vsel %vm877_vm12, %v888_v62, 0.0 }
 0x172   :  { %v892_v60 = vmul.f32 0.5, %v891_v56  ;;  %v926_v63 = vsel %vm904_vm10, %v924_v61, 0.0  ;;  %v901_v9 = vmul.f32 %v899_v4, %v1922_v12 }
 0x173   :  { %v928_v2 = vmul.f32 %v926_v63, %v1926_v19 }
 0x174   :  { %v893_v0 = vsub.f32 1.5, %v892_v60  ;;  %v929_v14 = vpack.c.bf16 %v901_v9, %v901_v9 }
 0x175   :  { %v1552_v5 = vpack.c.bf16 %v928_v2, %v927_v1 }
 0x176   :  { %v894_v3 = vmul.f32 %v1574_v50, %v893_v0  ;;  %v972_v16 = vunpack.c.l.b16 %v929_v14 }
 0x177   :  { %1553 = vst [vmem:[#allocation2] sm:$0xff] %v1552_v5  }
 0x178   :  { %v898_v6 = vsel %vm897_vm14, %v1574_v50, %v894_v3  ;;  %1563 = vst [vmem:[%s1958_s7] sm:$0xff] %v1552_v5  }
 0x179   :  { %v900_v8 = vsel %vm878_vm15, %v898_v6, 0.0 }
 0x17a   :  { %v902_v7 = vmul.f32 %v900_v8, %v1930_v23 }
 0x17c   :  { %v1557_v10 = vpack.c.bf16 %v902_v7, %v901_v9  ;;  %v930_v11 = vpack.c.bf16 %v902_v7, %v902_v7 }
 0x17e   :  { %1558 = vst [vmem:[%s1959_s6] sm:$0xff] %v1557_v10   ;;  %v1541_v13 = vld [vmem:[#allocation2] sm:$0xff]  ;;  %v973_v15 = vunpack.c.l.b16 %v930_v11 }
 0x17f   :  { %1031 = vmatpush.bf16.xpose.msrb.mxu2 %v1541_v13 }
 0x180   :  { %v974_v17 = vpack.c.b16 %v973_v15, %v972_v16 }
 0x186   :  { %1032 = vmatmul.bf16.vlgmr.msrb.gmra.mxu2 %v974_v17 }
 0x1a0   :  { %s1565_s18 = spop %1564 }
 0x1a1   :  { %v1038_v12 = vstv %s1565_s18 }
 0x209   :  { %v1033_v18 = vpop.f32.mrf.mxu2 }
 0x20a   :  { %v1039_v19 = vmul.f32 %v1038_v12, %v1033_v18 }
 0x20c   :  { %1041 = vst [vmem:[%s1960_s5] sm:$0xff] %v1039_v19 }
 0x211   :  { %v1035_v20 = vpop.f32.mrf.mxu2 }
 0x212   :  { %v1040_v21 = vmul.f32 %v1038_v12, %v1035_v20 }
 0x214   :  { %1042 = vst [vmem:[%s1960_s5 + $0x8] sm:$0xff] %v1040_v21 }

</bundles_post_ra>
